<compile_context>
chip_gen: v7x
topology: tpu7x:2x2x1
jax: 0.10.0
libtpu: 0.0.40
codegen_flags: <defaults>
</compile_context>

<pallas_src>
import functools

import jax
import jax.numpy as jnp
from jax.experimental import pallas as pl
from jax.experimental.pallas import tpu as pltpu


def _round_up(x, m):
    return ((x + m - 1) // m) * m


def _decoder_sum_kernel(z_ref, w_ref, b_ref, o_ref, acc_ref):
    """Grid = (M tiles [parallel], K tiles [arbitrary, last]).

    z_ref  : (tm, tk)        activation tile (natural layout, K = n_blocks*z_size)
    w_ref  : (tk, out_size)  W.T stacked n_blocks times (slice along K)
    b_ref  : (1, out_size)   n_blocks * bias (f32)
    o_ref  : (tm, out_size)  output tile (written on last K step)
    acc_ref: (tm, out_size)  f32 accumulator scratch
    """
    k = pl.program_id(1)

    @pl.when(k == 0)
    def _():
        acc_ref[...] = jnp.zeros_like(acc_ref)

    acc_ref[...] += jnp.dot(z_ref[...], w_ref[...],
                            preferred_element_type=jnp.float32)

    @pl.when(k == pl.num_programs(1) - 1)
    def _():
        o_ref[...] = (acc_ref[...] + b_ref[...]).astype(o_ref.dtype)


def _plan_tiles(M, K, out_size, z_bytes, w_bytes, o_bytes):
    """Pick (tm, tk, vmem_limit) from a per-generation VMEM budget."""
    try:
        vmem_cap = int(pltpu.get_tpu_info().vmem_capacity_bytes)
    except Exception:  # be conservative if the query is unavailable
        vmem_cap = 64 * 1024 * 1024
    # Leave headroom: never plan for more than half of physical VMEM
    # (v7x: 64 MiB physical -> ~32 MiB budget; v5e/v6e: 128 MiB -> 48 MiB).
    budget = min(vmem_cap // 2, 48 * 1024 * 1024)

    def footprint(tm, tk):
        z_tile = 2 * tm * tk * z_bytes            # double-buffered input
        w_tile = 2 * tk * out_size * w_bytes      # double-buffered weight slice
        b_tile = 2 * out_size * 4
        o_tile = 2 * tm * out_size * o_bytes      # double-buffered output
        acc = tm * out_size * 4                   # f32 accumulator scratch
        return z_tile + w_tile + b_tile + o_tile + acc

    def max_tk_for(tm):
        fixed = 2 * tm * out_size * o_bytes + tm * out_size * 4 + 2 * out_size * 4
        rem = budget - fixed
        denom = 2 * tm * z_bytes + 2 * out_size * w_bytes
        return rem // denom if rem > 0 else 0

    # Prefer ~1024-row tiles (~86% of HBM roofline measured for f32 streaming),
    # but guarantee >= 2 M-steps so the "parallel" axis can shard across v7x's
    # two TensorCores.
    tm = min(1024, _round_up(M, 8))
    if M > 8:
        tm = min(tm, _round_up(pl.cdiv(M, 2), 8))

    while True:
        tk_cap = max_tk_for(tm)
        if tk_cap >= K:
            tk = K            # single K step, full-K z tile fits the budget
            break
        # Tile K: largest multiple of 128 that divides K and fits the budget
        # (must divide K exactly so no garbage edge rows enter the reduction).
        tk = 0
        t = (min(tk_cap, K) // 128) * 128
        while t >= 128:
            if K % t == 0:
                tk = t
                break
            t -= 128
        if tk:
            break
        if tm > 8:
            tm = max(8, _round_up(tm // 2, 8))
            continue
        # Pathological K (no multiple-of-128 divisor fits): fall back to a
        # single full-K block and rely on the raised vmem limit.
        tk = K
        break

    fp = footprint(tm, tk)
    vmem_limit = int(min(vmem_cap - (4 << 20), max(fp + (8 << 20), 32 << 20)))
    return tm, tk, vmem_limit


@functools.partial(jax.jit, static_argnames=("z_size", "n_blocks"))
def decoder_sum_layer(z, weight, bias, *, z_size, n_blocks):
    """Pallas implementation of Decoder_Sum_Layer with a Linear decoder_block.

    z      : [B, S, n_blocks * z_size]
    weight : [out_size, z_size]   (PyTorch nn.Linear convention)
    bias   : [out_size]
    n_blocks is the flattened block count (np.prod(self.n_blocks) in the module).
    returns: [B, S, out_size]
    """
    B, S, Z = z.shape
    assert Z == n_blocks * z_size, "z last dim must equal n_blocks * z_size"
    out_size = weight.shape[0]
    M = B * S
    K = n_blocks * z_size

    # ---- parameter prep (tiny tensors; hoist/cache per weight-update if this
    # ---- layer is invoked repeatedly in a decode loop) ----------------------
    # sum_i z_i @ W.T  ==  z_flat @ tile(W.T, (n_blocks, 1))
    w_stacked = jnp.tile(weight.T, (n_blocks, 1)).astype(z.dtype)   # [K, out_size]
    # bias is added once per block in the reference -> scale by static n_blocks.
    b2d = (bias.astype(jnp.float32) * float(n_blocks)).reshape(1, out_size)

    # Free reshape — no transpose, no extra HBM pass over the activations.
    z_flat = z.reshape(M, K)

    z_bytes = jnp.dtype(z.dtype).itemsize
    o_bytes = z_bytes
    tm, tk, vmem_limit = _plan_tiles(M, K, out_size, z_bytes, z_bytes, o_bytes)
    grid = (pl.cdiv(M, tm), pl.cdiv(K, tk))

    cost = pl.CostEstimate(
        flops=2 * M * K * out_size,
        transcendentals=0,
        bytes_accessed=(M * K * z_bytes + K * out_size * z_bytes
                        + out_size * 4 + M * out_size * o_bytes),
    )

    out_flat = pl.pallas_call(
        _decoder_sum_kernel,
        out_shape=jax.ShapeDtypeStruct((M, out_size), z.dtype),
        grid_spec=pltpu.PrefetchScalarGridSpec(
            num_scalar_prefetch=0,
            grid=grid,
            in_specs=[
                pl.BlockSpec((tm, tk), lambda i, k: (i, k)),          # z tile
                pl.BlockSpec((tk, out_size), lambda i, k: (k, 0)),    # weight slice
                pl.BlockSpec((1, out_size), lambda i, k: (0, 0)),     # shared bias
            ],
            out_specs=pl.BlockSpec((tm, out_size), lambda i, k: (i, 0)),
            scratch_shapes=[pltpu.VMEM((tm, out_size), jnp.float32)],
        ),
        compiler_params=pltpu.CompilerParams(
            # M tiles independent -> shard across TensorCores; K is a reduction.
            dimension_semantics=("parallel", "arbitrary"),
            vmem_limit_bytes=vmem_limit,
        ),
        cost_estimate=cost,
    )(z_flat, w_stacked, b2d)

    return out_flat.reshape(B, S, out_size)


def decoder_sum_layer_ref(z, weight, bias, *, z_size, n_blocks):
    """Pure-JAX reference mirroring the PyTorch forward loop."""
    def block(x):
        return x @ weight.T + bias

    y = block(z[:, :, 0:z_size])
    for i in range(1, n_blocks):
        y = y + block(z[:, :, i * z_size:(i + 1) * z_size])
    return y


if __name__ == "__main__":
    # Small shapes consistent with the module's forward.
    B, S = 2, 8
    z_size = 32
    n_blocks = 4
    out_size = 32

    key = jax.random.PRNGKey(0)
    kz, kw, kb = jax.random.split(key, 3)

    z = jax.random.normal(kz, (B, S, n_blocks * z_size), dtype=jnp.float32)
    # Deterministic parameter init for the Linear decoder_block.
    weight = jax.random.normal(kw, (out_size, z_size), dtype=jnp.float32) * 0.05
    bias = jax.random.normal(kb, (out_size,), dtype=jnp.float32) * 0.05

    y = decoder_sum_layer(z, weight, bias, z_size=z_size, n_blocks=n_blocks)
    y = jax.block_until_ready(y)

    y_ref = decoder_sum_layer_ref(z, weight, bias, z_size=z_size, n_blocks=n_blocks)
    assert y.shape == (B, S, out_size)
    assert jnp.allclose(y, y_ref, atol=1e-4, rtol=1e-4), "mismatch vs reference"

    print("KERNEL_OK")
</pallas_src>

<mosaic_0001>
module attributes {stable_mosaic.version = 11 : i64} {
  func.func @_decoder_sum_kernel(%arg0: i32, %arg1: i32, %arg2: memref<8x128xf32, #tpu.memory_space<vmem>>, %arg3: memref<128x32xf32, #tpu.memory_space<vmem>>, %arg4: memref<1x32xf32, #tpu.memory_space<vmem>>, %arg5: memref<8x32xf32, #tpu.memory_space<vmem>>, %arg6: memref<8x32xf32, #tpu.memory_space<vmem>>) attributes {dimension_semantics = [#tpu.dimension_semantics<parallel>, #tpu.dimension_semantics<arbitrary>], iteration_bounds = array<i64: 2, 1>, scalar_prefetch = 0 : i64, scratch_operands = 1 : i64, tpu.core_type = #tpu.core_type<tc>, window_params = [{transform_indices = @transform_0, window_bounds = array<i64: 8, 128>}, {transform_indices = @transform_1, window_bounds = array<i64: 128, 32>}, {pipeline_mode = #tpu.pipeline_mode<synchronous>, transform_indices = @transform_2, window_bounds = array<i64: 1, 32>}, {transform_indices = @transform_3, window_bounds = array<i64: 8, 32>}]} {
    %c0_i32 = arith.constant 0 : i32
    %0 = arith.cmpi eq, %arg1, %c0_i32 : i32
    %1 = arith.extui %0 : i1 to i32
    %c0_i32_0 = arith.constant 0 : i32
    %2 = arith.cmpi ne, %1, %c0_i32_0 : i32
    scf.if %2 {
      %cst_10 = arith.constant 0.000000e+00 : f32
      %12 = vector.broadcast %cst_10 : f32 to vector<8x32xf32>
      %c0_11 = arith.constant 0 : index
      %c0_12 = arith.constant 0 : index
      %13 = vector.load %arg6[%c0_11, %c0_12] : memref<8x32xf32, #tpu.memory_space<vmem>>, vector<8x32xf32>
      tpu.vector_store %arg6[%c0_11, %c0_12], %12 {strides = array<i32>} : memref<8x32xf32, #tpu.memory_space<vmem>>, vector<8x32xf32>,
    } else {
    }
    %c0 = arith.constant 0 : index
    %c0_1 = arith.constant 0 : index
    %3 = vector.load %arg6[%c0, %c0_1] : memref<8x32xf32, #tpu.memory_space<vmem>>, vector<8x32xf32>
    %c0_2 = arith.constant 0 : index
    %c0_3 = arith.constant 0 : index
    %4 = vector.load %arg2[%c0_2, %c0_3] : memref<8x128xf32, #tpu.memory_space<vmem>>, vector<8x128xf32>
    %c0_4 = arith.constant 0 : index
    %c0_5 = arith.constant 0 : index
    %5 = vector.load %arg3[%c0_4, %c0_5] : memref<128x32xf32, #tpu.memory_space<vmem>>, vector<128x32xf32>
    %cst = arith.constant dense<0.000000e+00> : vector<8x32xf32>
    %6 = tpu.matmul %4, %5, %cst {dimension_numbers = #tpu.dot_dimension_numbers<[1], [0], [0], [1], [0, 0, 1, 1], [], []>} : vector<8x128xf32>, vector<128x32xf32>, vector<8x32xf32> -> vector<8x32xf32>
    %7 = arith.addf %3, %6 : vector<8x32xf32>
    %c0_6 = arith.constant 0 : index
    %c0_7 = arith.constant 0 : index
    %8 = vector.load %arg6[%c0_6, %c0_7] : memref<8x32xf32, #tpu.memory_space<vmem>>, vector<8x32xf32>
    tpu.vector_store %arg6[%c0_6, %c0_7], %7 {strides = array<i32>} : memref<8x32xf32, #tpu.memory_space<vmem>>, vector<8x32xf32>,
    %c0_i32_8 = arith.constant 0 : i32
    %9 = arith.cmpi eq, %arg1, %c0_i32_8 : i32
    %10 = arith.extui %9 : i1 to i32
    %c0_i32_9 = arith.constant 0 : i32
    %11 = arith.cmpi ne, %10, %c0_i32_9 : i32
    scf.if %11 {
      %c0_10 = arith.constant 0 : index
      %c0_11 = arith.constant 0 : index
      %12 = vector.load %arg6[%c0_10, %c0_11] : memref<8x32xf32, #tpu.memory_space<vmem>>, vector<8x32xf32>
      %c0_12 = arith.constant 0 : index
      %c0_13 = arith.constant 0 : index
      %13 = vector.load %arg4[%c0_12, %c0_13] : memref<1x32xf32, #tpu.memory_space<vmem>>, vector<1x32xf32>
      %14 = vector.broadcast %13 : vector<1x32xf32> to vector<8x32xf32>
      %15 = arith.addf %12, %14 : vector<8x32xf32>
      %c0_14 = arith.constant 0 : index
      %c0_15 = arith.constant 0 : index
      %16 = vector.load %arg5[%c0_14, %c0_15] : memref<8x32xf32, #tpu.memory_space<vmem>>, vector<8x32xf32>
      tpu.vector_store %arg5[%c0_14, %c0_15], %15 {strides = array<i32>} : memref<8x32xf32, #tpu.memory_space<vmem>>, vector<8x32xf32>,
    } else {
    }
    return
  }
  func.func @transform_0(%arg0: i32, %arg1: i32) -> (i32, i32) {
    %c0_i32 = arith.constant 0 : i32
    return %arg0, %arg1 : i32, i32
  }
  func.func @transform_1(%arg0: i32, %arg1: i32) -> (i32, i32) {
    %c0_i32 = arith.constant 0 : i32
    %c0_i32_0 = arith.constant 0 : i32
    return %arg1, %c0_i32 : i32, i32
  }
  func.func @transform_2(%arg0: i32, %arg1: i32) -> (i32, i32) {
    %c0_i32 = arith.constant 0 : i32
    %c0_i32_0 = arith.constant 0 : i32
    %c0_i32_1 = arith.constant 0 : i32
    return %c0_i32, %c0_i32_0 : i32, i32
  }
  func.func @transform_3(%arg0: i32, %arg1: i32) -> (i32, i32) {
    %c0_i32 = arith.constant 0 : i32
    %c0_i32_0 = arith.constant 0 : i32
    return %arg0, %c0_i32 : i32, i32
  }
}

</mosaic_0001>

<bundles_post_ra>
// kernel: decoder_sum_layer.1
= control target key start
LH: loop header
LB: loop body
LE: loop exit
PB: predicated region body
PF: predicated region fallthrough
CT: control target
= control target key end

     0   :  { %8 = vsyncpa [#allocation4], 0  ;;  %s837_s0 = inlined_call_operand.vmem [shape: f32[16,128], index: 0, kind: input, shape index: {}]   ;;  %s838_s1 = inlined_call_operand.vmem [shape: f32[128,32], index: 1, kind: input, shape index: {}]   ;;  %s839_s2 = inlined_call_operand.vmem [shape: f32[1,32], index: 2, kind: input, shape index: {}]   ;;  %s840_s3 = inlined_call_operand.hbm [shape: f32[16,32], index: 3, kind: output, shape index: {}]  }
   0x1   :  { %10 = vsyncpa [#allocation4 + $0x1], 0  ;;  %s671_s12 = smov 0   ;;  %s673_s13 = smov 0  }
   0x2   :  { %s675_s14 = smov 0   ;;  %s677_s15 = smov 0  }
   0x3   :  { %s679_s16 = smov 0   ;;  %s681_s17 = smov 0  }
   0x4 LB: > { %s420_s18 = sadd.s32 4294967295, %s645_s17   ;;  %s421_s19 = sadd.s32 4294967294, %s645_s17   ;;  %s645_s17 = sphi %s681_s17, %s16_s17   ;;  %s641_s16 = sphi %s679_s16, %s847_s16   ;;  %s637_s15 = sphi %s677_s15, %s846_s15   ;;  %s633_s14 = sphi %s675_s14, %s845_s14   ;;  %s629_s13 = sphi %s673_s13, %s844_s13   ;;  %s625_s12 = sphi %s671_s12, %s843_s12  }
   0x5   : > { %s28_s20 = sadd.s32 1, %s641_s16  ;;  %s110_s21 = sadd.s32 1, %s633_s14 }
   0x6   : > { %p30_p0 = scmp.ge.s32.totalorder %s28_s20, 2  ;;  %p120_p1 = scmp.ne.s32.totalorder %s633_s14, %s629_s13 }
   0x7   : > { %p121_p2 = scmp.eq.s32.totalorder %s420_s18, 1  ;;  %p126_p3 = scmp.ne.s32.totalorder %s629_s13, %s625_s12 }
   0x8   : > { %s849_s20 = smov (%p30_p0, %s28_s20), 0  ;;  %p127_p5 = scmp.eq.s32.totalorder %s421_s19, 1 }
   0x9   : > { %p711_p4 = por %p121_p2, %p120_p1  ;;  %s107_s23 = ssub.s32 %s641_s16, %s849_s20 }
   0xa   : > { %p425_p6 = scmp.ge.s32.totalorder %s645_s17, 1  ;;  %p108_p7 = scmp.eq.s32.totalorder %s107_s23, 0 }
   0xb   : > { %p718_p8 = por %p127_p5, %p126_p3  ;;  %p167_p9 = scmp.lt.s32.totalorder %s645_s17, 3 }
   0xc   : > { %s724_s25 = scalar_select %p108_p7, %s633_s14, %s110_s21  }
   0xd   : > { %p168_p10 = pnand %p425_p6, %p167_p9 }
   0xe   : > { %v219_v0 = vld [vmem:[%s838_s1] sm:$0xff] (!%p168_p10)  ;;  %v220_v1 = vld [vmem:[%s838_s1 + $0x8] sm:$0xff] (!%p168_p10)  ;;  %v221_v2 = vld [vmem:[%s838_s1 + $0x10] sm:$0xff] (!%p168_p10)  ;;  %vm215_vm0 = vcmask (!%p168_p10), 261120   ;;  %v647_v3 = vmov (!%p168_p10), 0.0|0.0   ;;  %v648_v6 = vmov (!%p168_p10), 0.0  }
   0xf   : > { %171 = sbr.rel (%p168_p10) target bundleno = 286 (0x11e), region = 32  ;;  %485 = vmatprep.subr.bf16.mxu0 (!%p168_p10), %v647_v3  ;;  %v486_v4 = vpack.c.bf16 (!%p168_p10), %v220_v1, %v219_v0  ;;  %v222_v5 = vld [vmem:[%s838_s1 + $0x18] sm:$0xff] (!%p168_p10)  ;;  %216 = vst.msk [vmem:[#allocation2] sm:$0xff] (!%p168_p10), %vm215_vm0, %v648_v6  ;;  %vm649_vm1 = vmmov (!%p168_p10), 0   ;;  %v223_v8 = vld [vmem:[%s838_s1 + $0x20] sm:$0xff] (!%p168_p10)  ;;  %v224_v9 = vld [vmem:[%s838_s1 + $0x28] sm:$0xff] (!%p168_p10) }
  0x10   : > { %482 = vmatprep.mubr.msk.f32.mxu0 (!%p168_p10), %vm649_vm1, %v648_v6  ;;  %v489_v7 = vpack.c.bf16 (!%p168_p10), %v222_v5, %v221_v2  ;;  %v492_v10 = vpack.c.bf16 (!%p168_p10), %v224_v9, %v223_v8  ;;  %v225_v11 = vld [vmem:[%s838_s1 + $0x30] sm:$0xff] (!%p168_p10)  ;;  %v226_v12 = vld [vmem:[%s838_s1 + $0x38] sm:$0xff] (!%p168_p10)  ;;  %v227_v14 = vld [vmem:[%s838_s1 + $0x40] sm:$0xff] (!%p168_p10)  ;;  %p198_p11 = scmp.lt.s32.totalorder (!%p168_p10), %s637_s15, 1  ;;  %s195_s29 = sand.u32 (!%p168_p10), 1, %s629_s13  }
  0x11   : > { %487 = vmatpush3.bf16.msra.mxu0 (!%p168_p10), %v486_v4  ;;  %v495_v13 = vpack.c.bf16 (!%p168_p10), %v226_v12, %v225_v11  ;;  %v228_v15 = vld [vmem:[%s838_s1 + $0x48] sm:$0xff] (!%p168_p10)  ;;  %v229_v17 = vld [vmem:[%s838_s1 + $0x50] sm:$0xff] (!%p168_p10)  ;;  %v230_v18 = vld [vmem:[%s838_s1 + $0x58] sm:$0xff] (!%p168_p10)  ;;  %s426_s30 = sshll.u32 (!%p168_p10), %s195_s29, 3  ;;  %s430_s6 = sshll.u32 (!%p168_p10), %s637_s15, 7 }
  0x12   : > { %488 = vmatprep.subr.bf16.mxu0 (!%p168_p10), %v647_v3  ;;  %v498_v16 = vpack.c.bf16 (!%p168_p10), %v228_v15, %v227_v14  ;;  %v501_v19 = vpack.c.bf16 (!%p168_p10), %v230_v18, %v229_v17  ;;  %v231_v20 = vld [vmem:[%s838_s1 + $0x60] sm:$0xff] (!%p168_p10)  ;;  %v232_v21 = vld [vmem:[%s838_s1 + $0x68] sm:$0xff] (!%p168_p10)  ;;  %v233_v23 = vld [vmem:[%s838_s1 + $0x70] sm:$0xff] (!%p168_p10)  ;;  %s197_s7 = scalar_lea.vmem (!%p168_p10), [#allocation3], %s426_s30  ;;  %s789_s11 = scalar_lea.hbm (!%p168_p10), %s840_s3, %s430_s6 }
  0x13   : > { %v504_v22 = vpack.c.bf16 (!%p168_p10), %v232_v21, %v231_v20  ;;  %v234_v24 = vld [vmem:[%s838_s1 + $0x78] sm:$0xff] (!%p168_p10)  ;;  %v428_v31 = vld [vmem:[%s839_s2] ss:$0 sm:$0xff] (!%p168_p10)  ;;  %s335_s8 = sshll.u32 (!%p168_p10), %s197_s7, 4  ;;  %s322_s18 = scalar_lea.sflag (!%p168_p10), [#allocation4], %s195_s29  ;;  %s791_s8 = int_to_ptr.vmem [resolvable:$true] %s335_s8 }
  0x14   : > { %v507_v25 = vpack.c.bf16 (!%p168_p10), %v234_v24, %v233_v23  ;;  %s567_s19 = scalar_lea.vmem (!%p168_p10), %s791_s8, 128 }
  0x15   : > { %490 = vmatpush3.bf16.msra.mxu0 (!%p168_p10), %v489_v7  ;;  %p568_p12 = scmp.ne.s32.totalorder (!%p168_p10), %s791_s8, %s567_s19 }
  0x16   : > { %491 = vmatprep.subr.bf16.mxu0 %v647_v3  ;;  %s199_s10 = scalar_select %p198_p11, %s637_s15, 1  ;;  %v217_v27 = vld [vmem:[#allocation2] sm:$0xff] }
  0x17   : > { %p569_p13 = pnand %p568_p12, %p711_p4  ;;  %s650_s15 = smov [#allocation3]  }
  0x18   : > { %s427_s23 = sshll.u32 %s199_s10, 3  ;;  %s571_s21 = sshll.u32 %s650_s15, 4  ;;  %s572_s21 = int_to_ptr.vmem [resolvable:$false] %s571_s21 }
  0x19   : > { %493 = vmatpush3.bf16.msra.mxu0 %v492_v10  ;;  %s204_s28 = scalar_lea.vmem %s837_s0, %s427_s23  ;;  %p570_p0 = pneg %p569_p13 }
  0x1a   : > { %494 = vmatprep.subr.bf16.mxu0 %v647_v3  ;;  %v218_v26 = vld [vmem:[%s204_s28] sm:$0xff]  ;;  %s573_s23 = scalar_lea.vmem %s572_s21, 256  ;;  %p574_p1 = scmp.lt.s32.totalorder %s791_s8, %s572_s21 }
  0x1b   : > { %p575_p2 = scmp.lt.s32.totalorder %s573_s23, %s567_s19 }
  0x1d   : > { %496 = vmatpush3.bf16.msra.mxu0 %v495_v13  ;;  %p576_p3 = por %p575_p2, %p574_p1 }
  0x1e   : > { %497 = vmatprep.subr.bf16.mxu0 %v647_v3 }
  0x1f   : > { %p577_p5 = pnand %p576_p3, %p570_p0 }
  0x21   : > { %499 = vmatpush3.bf16.msra.mxu0 %v498_v16 }
  0x22   : > { %500 = vmatprep.subr.bf16.mxu0 %v647_v3 }
  0x25   : > { %502 = vmatpush3.bf16.msra.mxu0 %v501_v19 }
  0x26   : > { %503 = vmatprep.subr.bf16.mxu0 %v647_v3 }
  0x29   : > { %505 = vmatpush3.bf16.msra.mxu0 %v504_v22 }
  0x2a   : > { %506 = vmatprep.subr.bf16.mxu0 %v647_v3 }
  0x2d   : > { %508 = vmatpush3.bf16.msra.mxu0 %v507_v25 }
  0x30   : > { %483 = vmatmul.mubr.f32.vlgmr.msra.gmra.mrb[0].mxu0 %v218_v26 }
 0x103   : > { %v301_v28 = vpop.f32.mrb[0].mxu0 }
 0x104   : > { %v305_v29 = vadd.f32 %v301_v28, %v217_v27  ;;  %v484_v30 = vpop.f32.mrb[1].mxu0 }
 0x106   : > { %307 = vst.msk [vmem:[#allocation2] sm:$0xff] %vm215_vm0, %v305_v29 }
 0x10d   : > { %v311_v32 = vld [vmem:[#allocation2] sm:$0xff] }
 0x10e   : > { %v319_v33 = vadd.f32 %v428_v31, %v311_v32 }
 0x110   : > { %320 = vst.msk [vmem:[%s197_s7] sm:$0xff] %vm215_vm0, %v319_v33 }
 0x111   : > { %580 = shalt.err (!%p577_p5)
}
 0x112   : > { %s581_s26 = scalar_lea.hbm %s789_s11, 128  ;;  %s585_s29 = scalar_lea.hbm %s840_s3, 256 }
 0x113   : > { %p582_p6 = scmp.ne.s32.totalorder %s789_s11, %s581_s26  ;;  %p586_p10 = scmp.lt.u32.totalorder %s789_s11, %s840_s3 }
 0x114   : > { %p587_p11 = scmp.lt.u32.totalorder %s585_s29, %s581_s26  ;;  %p589_p13 = scmp.lt.u32.totalorder %s581_s26, %s789_s11 }
 0x115   : > { %p583_p7 = pnand %p582_p6, %p711_p4 }
 0x116   : > { %p588_p12 = por %p587_p11, %p586_p10 }
 0x117   : > { %p584_p9 = pneg %p583_p7 }
 0x118   : > { %p590_p0 = por %p589_p13, %p588_p12 }
 0x11a   : > { %p591_p1 = pnand %p590_p0, %p584_p9 }
 0x11c   : > { %594 = shalt.err (!%p591_p1)
}
 0x11d   : > { %509 = dma.vmem_to_hbm [thread:$0]  (%p711_p4), %s791_s8, 128, %s789_s11, %s322_s18  }
 0x11e PF: > { %p515_p2 = scmp.ge.s32.totalorder %s645_s17, 2  ;;  %s347_s5 = sand.u32 1, %s625_s12  }
 0x11f   : > { %s348_s6 = scalar_lea.sflag [#allocation4], %s347_s5 }
 0x120   : > { %p512_p3 = pnand %p515_p2, %p718_p8 }
 0x122   : > { %620 = dma.done.wait (!%p512_p3), %s348_s6, 128  }
 0x123   : > { %622 = vsyncadd (!%p512_p3), %s348_s6, 4294967168  ;;  %s16_s17 = sadd.s32 1, %s645_s17   ;;  %s843_s12 = smov %s629_s13 }
 0x124   : > { %p13_p5 = scmp.ge.s32.totalorder %s16_s17, 4   ;;  %s844_s13 = smov %s633_s14 }
 0x125   : > { %s845_s14 = smov %s724_s25  ;;  %s846_s15 = smov %s641_s16 }
 0x126   : > { %s847_s16 = smov %s849_s20  ;;  %15 = sbr.rel (!%p13_p5) target bundleno = 4 (0x4), region = 78 }
 0x12d   :  { %353 = vsyncpa [#allocation4], 1 }
 0x12e   :  { %355 = vsyncpa [#allocation4 + $0x1], 1 }

</bundles_post_ra>
